<compile_context>
chip_gen: v5e
topology: v5e:2x2
jax: 0.10.0
libtpu: 0.0.40
codegen_flags: <defaults>
</compile_context>

<pallas_src>
import functools

import jax
import jax.numpy as jnp
from jax.experimental import pallas as pl
from jax.experimental.pallas import tpu as pltpu

EPS = 1e-6  # torch.nn.PairwiseDistance default eps (added to the difference, per PyTorch)


def _round_up(x, m):
    return ((x + m - 1) // m) * m


def _next_pow2(n):
    p = 1
    while p < n:
        p *= 2
    return p


def _dist_logits_kernel(blk_ref, bnd_ref, h_ref, sqn_ref, emb_ref,
                        logits_ref, lse_ref, m_sc, l_sc, *, temp):
    """One grid step = one TILE_N-row block of the embedding table.

    blk_ref : SMEM int32 [n_tiles]      table block-row index per grid step
    bnd_ref : SMEM int32 [5]            (a0, a1, b0, b1, n_real_tiles) valid vocab-row ranges
    h_ref   : VMEM f32  [1, Dpad]       hidden + eps (eps only on valid feature lanes)
    sqn_ref : VMEM f32  [1, TILE_N]     precomputed ||embed_row||^2 for this block
    emb_ref : VMEM      [TILE_N, Dpad]  embedding rows for this block (f32 or bf16)
    logits_ref : [1, TILE_N] lane-dense unnormalized logits (this tile)
    lse_ref    : [1, 1]      log-sum-exp over all valid candidates (written on last tile)
    m_sc, l_sc : VMEM f32 [1, 1] running max / running sum for the online log-sum-exp
    """
    i = pl.program_id(0)
    tile_n = logits_ref.shape[-1]

    @pl.when(i == 0)
    def _():
        m_sc[...] = jnp.full_like(m_sc, -jnp.inf)
        l_sc[...] = jnp.zeros_like(l_sc)

    h = h_ref[...]                                       # [1, Dpad] f32 (eps folded in)
    o = emb_ref[...]                                     # [TILE_N, Dpad]
    prec = jax.lax.Precision.HIGHEST if o.dtype == jnp.float32 else None
    # Cross term on the MXU, directly lane-dense: [1, Dpad] x [TILE_N, Dpad]^T -> [1, TILE_N]
    xt = jax.lax.dot_general(
        h.astype(o.dtype), o,
        dimension_numbers=(((1,), (1,)), ((), ())),
        precision=prec,
        preferred_element_type=jnp.float32)
    hn = jnp.sum(h * h, axis=-1, keepdims=True)          # [1, 1]
    d2 = hn + sqn_ref[...] - 2.0 * xt                    # [1, TILE_N] squared L2 distance
    logits = (-temp) * d2

    # Mask rows outside the candidate ranges (and bucket-padded tiles).
    row0 = blk_ref[i] * tile_n
    cols = jax.lax.broadcasted_iota(jnp.int32, logits.shape, 1) + row0
    a0, a1, b0, b1, n_real = (bnd_ref[0], bnd_ref[1], bnd_ref[2], bnd_ref[3], bnd_ref[4])
    valid = ((cols >= a0) & (cols < a1)) | ((cols >= b0) & (cols < b1))
    valid = jnp.logical_and(valid, i < n_real)
    logits = jnp.where(valid, logits, -jnp.inf)
    logits_ref[...] = logits

    # Online log-sum-exp across tiles.  The where() on p keeps fully-masked (bucket-padded)
    # tiles NaN-free; alpha guard covers the run-max-still--inf case.
    m_prev = m_sc[...]
    m_new = jnp.maximum(m_prev, jnp.max(logits, axis=-1, keepdims=True))
    alpha = jnp.where(m_new > -jnp.inf, jnp.exp(m_prev - m_new), 0.0)
    p = jnp.where(valid, jnp.exp(logits - m_new), 0.0)
    l_sc[...] = alpha * l_sc[...] + jnp.sum(p, axis=-1, keepdims=True)
    m_sc[...] = m_new

    @pl.when(i == pl.num_programs(0) - 1)
    def _():
        lse_ref[...] = m_sc[...] + jnp.log(l_sc[...])


@functools.partial(jax.jit, static_argnames=("temp", "tile_n"))
def _distance_logits(blk_idx, bounds, h_eff, sq_norms, embed, *, temp, tile_n):
    """Returns (logits_flat [n_tiles*tile_n] f32, lse scalar f32)."""
    num_tiles = blk_idx.shape[0]
    dpad = embed.shape[1]
    logits, lse = pl.pallas_call(
        functools.partial(_dist_logits_kernel, temp=temp),
        out_shape=(
            jax.ShapeDtypeStruct((1, num_tiles * tile_n), jnp.float32),
            jax.ShapeDtypeStruct((1, 1), jnp.float32),
        ),
        grid_spec=pltpu.PrefetchScalarGridSpec(
            num_scalar_prefetch=2,                      # blk_idx, bounds -> SMEM
            grid=(num_tiles,),
            in_specs=[
                pl.BlockSpec((1, dpad), lambda i, blk, bnd: (0, 0)),          # hidden
                pl.BlockSpec((1, tile_n), lambda i, blk, bnd: (0, blk[i])),   # ||o||^2
                pl.BlockSpec((tile_n, dpad), lambda i, blk, bnd: (blk[i], 0)),  # embeddings
            ],
            out_specs=(
                pl.BlockSpec((1, tile_n), lambda i, blk, bnd: (0, i)),        # logits (lane-dense)
                pl.BlockSpec((1, 1), lambda i, blk, bnd: (0, 0)),             # lse accumulator
            ),
            scratch_shapes=[
                pltpu.VMEM((1, 1), jnp.float32),   # running max
                pltpu.VMEM((1, 1), jnp.float32),   # running sum
            ],
        ),
        compiler_params=pltpu.CompilerParams(
            dimension_semantics=("arbitrary",)),       # reduction axis (online lse)
    )(blk_idx, bounds, h_eff, sq_norms, embed)
    return logits[0], lse[0, 0]


class SplitCrossEntropy:
    """JAX/Pallas port of the PyTorch SplitCrossEntropy module (forward semantics)."""

    def __init__(self, ntokens, temp, splits, tile_n=None, embed_dtype=jnp.float32):
        self.ntokens = ntokens
        self.temp = float(temp)
        self.splits = splits
        self.nsplits = len(splits) - 1
        self.tombstone_base = self.ntokens - self.nsplits + 1
        # Candidate-row tile size: multiple of 128 (lane-dense output), ~512 by default.
        # NOTE: for very large D on v7x (64 MiB VMEM) keep tile_n*Dpad*bytes*2 well under
        # the scoped VMEM limit; on v5e/v6e (128 MiB) larger tiles (1024-2048) are fine.
        self.tile_n = tile_n or max(128, min(512, _round_up(ntokens, 128)))
        self.embed_dtype = embed_dtype
        self._prepared_src = None

    # ---------- one-time preparation of the embedding table (amortized) ----------
    def _maybe_prepare(self, model_embed):
        if self._prepared_src is model_embed:
            return
        nt, d = model_embed.shape
        dpad = _round_up(d, 128)
        rpad = _round_up(nt, self.tile_n)
        emb32 = model_embed.astype(jnp.float32)
        sq = jnp.sum(emb32 * emb32, axis=-1)                       # ||o||^2 in f32, exact
        self._sq_norms = jnp.pad(sq, (0, rpad - nt)).reshape(1, rpad)
        self._embed_pad = jnp.pad(emb32, ((0, rpad - nt), (0, dpad - d))).astype(self.embed_dtype)
        self._model_embed = model_embed
        self._d, self._dpad, self._rpad = d, dpad, rpad
        self._prepared_src = model_embed

    def _head_ranges(self):
        a = (0, min(self.ntokens, self.splits[1]))
        b = (self.tombstone_base, self.ntokens) if self.nsplits > 1 else (0, 0)
        return a, b

    # ---------- kernel launch over <=2 contiguous vocab ranges ----------
    def _range_log_probs(self, model_embed, hidden, rng_a, rng_b):
        self._maybe_prepare(model_embed)
        T = self.tile_n
        a0, a1 = int(rng_a[0]), int(rng_a[1])
        b0, b1 = int(rng_b[0]), int(rng_b[1])
        blocks = set(range(a0 // T, -(-a1 // T)))
        if b1 > b0:
            blocks |= set(range(b0 // T, -(-b1 // T)))
        blocks = sorted(blocks)
        n_real = len(blocks)
        n_buck = _next_pow2(n_real)                                # bound recompiles
        blk_idx = jnp.asarray(blocks + [blocks[-1]] * (n_buck - n_real), dtype=jnp.int32)
        bounds = jnp.asarray([a0, a1, b0, b1, n_real], dtype=jnp.int32)
        h = jnp.asarray(hidden, dtype=jnp.float32).reshape(1, -1) + EPS   # eps on valid lanes only
        h_eff = jnp.pad(h, ((0, 0), (0, self._dpad - self._d)))
        logits_flat, lse = _distance_logits(
            blk_idx, bounds, h_eff, self._sq_norms, self._embed_pad,
            temp=self.temp, tile_n=T)
        return logits_flat, lse, blocks

    def candidate_log_probs(self, model_embed, hidden, rng_a, rng_b=(0, 0)):
        """Full candidate-ordered log-softmax vector for rows [a0,a1) ++ [b0,b1)."""
        logits_flat, lse, blocks = self._range_log_probs(model_embed, hidden, rng_a, rng_b)
        T = self.tile_n
        block_pos = jnp.zeros((self._rpad // T,), dtype=jnp.int32)
        block_pos = block_pos.at[jnp.asarray(blocks, dtype=jnp.int32)].set(
            jnp.arange(len(blocks), dtype=jnp.int32))
        rows = jnp.concatenate([
            jnp.arange(rng_a[0], rng_a[1], dtype=jnp.int32),
            jnp.arange(rng_b[0], rng_b[1], dtype=jnp.int32)])
        lanes = block_pos[rows // T] * T + (rows % T)
        return logits_flat[lanes] - lse

    # ---------- forward (split / tombstone control flow of the reference) ----------
    def forward(self, model_embed, target, hidden):
        # TODO(synk): the reference calls an external recurrent `model(token_batch, hidden)`
        # in minibatches; here the model is a synthetic deterministic embedding lookup, so
        # `outputs[j]` == model_embed[token_j].  The distance + log-softmax hot path runs in
        # the Pallas kernel above.
        target = int(target)
        self._maybe_prepare(model_embed)
        T = self.tile_n

        head_a, head_b = self._head_ranges()
        logits_flat, lse, blocks = self._range_log_probs(model_embed, hidden, head_a, head_b)
        pos = {blk: p for p, blk in enumerate(blocks)}

        def lane(r):
            return pos[r // T] * T + (r % T)

        if target < self.splits[1]:
            entropy = -(logits_flat[lane(target)] - lse)
            new_hidden = self._model_embed[target]
        else:
            i = 0
            while self.splits[i + 1] <= target:
                i = i + 1
            tomb_row = self.tombstone_base + (i - 1)                 # vocab row of the tombstone
            head_lp = logits_flat[lane(tomb_row)] - lse
            new_hidden = self._model_embed[tomb_row]
            left, right = self.splits[i], min(self.splits[i + 1], self.tombstone_base)
            t_logits, t_lse, t_blocks = self._range_log_probs(
                model_embed, new_hidden, (left, right), (0, 0))
            t_pos = {blk: p for p, blk in enumerate(t_blocks)}
            t_lane = t_pos[target // T] * T + (target % T)
            tail_lp = t_logits[t_lane] - t_lse
            entropy = -(head_lp + tail_lp)
            new_hidden = self._model_embed[target]
        return float(entropy), jax.lax.stop_gradient(new_hidden)


def _ref_logp(hidden, outputs, temp):
    d2 = jnp.sum((hidden[None, :] - outputs + EPS) ** 2, axis=-1)
    return jax.nn.log_softmax(-temp * d2, axis=0)


if __name__ == "__main__":
    key = jax.random.PRNGKey(0)
    k1, k2, k3, k4 = jax.random.split(key, 4)

    # ---- Config 1: tiny vocab, D not lane-aligned (exercises D padding + eps handling) ----
    ntokens, temp, splits, D = 20, 0.5, [0, 10, 20], 32
    embed = jax.random.normal(k1, (ntokens, D), dtype=jnp.float32)
    hidden = jax.random.normal(k2, (D,), dtype=jnp.float32)
    crit = SplitCrossEntropy(ntokens, temp, splits)

    e_head, nh_head = crit.forward(embed, 3, hidden)      # head-branch target
    e_tail, nh_tail = crit.forward(embed, 14, hidden)     # tail (split) target
    jax.block_until_ready((nh_head, nh_tail))

    ra, rb = crit._head_ranges()
    cand = jnp.concatenate([jnp.arange(*ra), jnp.arange(*rb)])
    got = jax.block_until_ready(crit.candidate_log_probs(embed, hidden, ra, rb))
    want = _ref_logp(hidden, embed[cand], temp)
    assert jnp.allclose(got, want, atol=2e-4, rtol=1e-4), float(jnp.max(jnp.abs(got - want)))

    ref_e_head = float(-want[3])
    assert abs(e_head - ref_e_head) < 1e-3
    tomb_cand_idx = splits[1] + 1 - 1                      # candidate index of the tombstone
    ref_tail = _ref_logp(embed[19], embed[10:19], temp)
    ref_e_tail = float(-(want[tomb_cand_idx] + ref_tail[14 - 10]))
    assert abs(e_tail - ref_e_tail) < 1e-3
    assert jnp.allclose(nh_head, embed[3]) and jnp.allclose(nh_tail, embed[14])

    # ---- Config 2: larger vocab -> multiple N tiles, online lse + tile bucketing ----
    ntokens2, splits2, D2 = 600, [0, 300, 600], 48
    embed2 = jax.random.normal(k3, (ntokens2, D2), dtype=jnp.float32)
    hidden2 = jax.random.normal(k4, (D2,), dtype=jnp.float32)
    crit2 = SplitCrossEntropy(ntokens2, temp, splits2, tile_n=128)
    ra2, rb2 = crit2._head_ranges()
    cand2 = jnp.concatenate([jnp.arange(*ra2), jnp.arange(*rb2)])
    got2 = jax.block_until_ready(crit2.candidate_log_probs(embed2, hidden2, ra2, rb2))
    want2 = _ref_logp(hidden2, embed2[cand2], temp)
    assert jnp.allclose(got2, want2, atol=2e-4, rtol=1e-4), float(jnp.max(jnp.abs(got2 - want2)))
    e2, nh2 = crit2.forward(embed2, 450, hidden2)
    jax.block_until_ready(nh2)
    assert jnp.isfinite(e2) and jnp.allclose(nh2, embed2[450])

    # ---- bf16-streamed embeddings (halved HBM traffic), f32 accumulation ----
    crit_bf16 = SplitCrossEntropy(ntokens2, temp, splits2, tile_n=128, embed_dtype=jnp.bfloat16)
    got_bf16 = jax.block_until_ready(crit_bf16.candidate_log_probs(embed2, hidden2, ra2, rb2))
    assert bool(jnp.all(jnp.isfinite(got_bf16)))

    print("KERNEL_OK")
</pallas_src>

<mosaic_0001>
module attributes {stable_mosaic.version = 11 : i64} {
  func.func @_dist_logits_kernel(%arg0: i32, %arg1: memref<1xi32, #tpu.memory_space<smem>>, %arg2: memref<5xi32, #tpu.memory_space<smem>>, %arg3: memref<1x128xf32, #tpu.memory_space<vmem>>, %arg4: memref<1x128xf32, #tpu.memory_space<vmem>>, %arg5: memref<128x128xf32, #tpu.memory_space<vmem>>, %arg6: memref<1x128xf32, #tpu.memory_space<vmem>>, %arg7: memref<1x1xf32, #tpu.memory_space<vmem>>, %arg8: memref<1x1xf32, #tpu.memory_space<vmem>>, %arg9: memref<1x1xf32, #tpu.memory_space<vmem>>) attributes {dimension_semantics = [#tpu.dimension_semantics<arbitrary>], iteration_bounds = array<i64: 1>, scalar_prefetch = 2 : i64, scratch_operands = 2 : i64, tpu.core_type = #tpu.core_type<tc>, window_params = [{pipeline_mode = #tpu.pipeline_mode<synchronous>, transform_indices = @transform_0, window_bounds = array<i64: 1, 128>}, {transform_indices = @transform_1, window_bounds = array<i64: 1, 128>}, {transform_indices = @transform_2, window_bounds = array<i64: 128, 128>}, {transform_indices = @transform_3, window_bounds = array<i64: 1, 128>}, {pipeline_mode = #tpu.pipeline_mode<synchronous>, transform_indices = @transform_4, window_bounds = array<i64: 1, 1>}]} {
    %c0_i32 = arith.constant 0 : i32
    %0 = arith.cmpi eq, %arg0, %c0_i32 : i32
    %1 = arith.extui %0 : i1 to i32
    %c0_i32_0 = arith.constant 0 : i32
    %2 = arith.cmpi ne, %1, %c0_i32_0 : i32
    scf.if %2 {
      %cst_28 = arith.constant 0xFF800000 : f32
      %70 = vector.broadcast %cst_28 : f32 to vector<1x1xf32>
      %c0_29 = arith.constant 0 : index
      %c0_30 = arith.constant 0 : index
      %71 = vector.load %arg8[%c0_29, %c0_30] : memref<1x1xf32, #tpu.memory_space<vmem>>, vector<1x1xf32>
      tpu.vector_store %arg8[%c0_29, %c0_30], %70 {strides = array<i32>} : memref<1x1xf32, #tpu.memory_space<vmem>>, vector<1x1xf32>,
      %cst_31 = arith.constant 0.000000e+00 : f32
      %72 = vector.broadcast %cst_31 : f32 to vector<1x1xf32>
      %c0_32 = arith.constant 0 : index
      %c0_33 = arith.constant 0 : index
      %73 = vector.load %arg9[%c0_32, %c0_33] : memref<1x1xf32, #tpu.memory_space<vmem>>, vector<1x1xf32>
      tpu.vector_store %arg9[%c0_32, %c0_33], %72 {strides = array<i32>} : memref<1x1xf32, #tpu.memory_space<vmem>>, vector<1x1xf32>,
    } else {
    }
    %c0 = arith.constant 0 : index
    %c0_1 = arith.constant 0 : index
    %3 = vector.load %arg3[%c0, %c0_1] : memref<1x128xf32, #tpu.memory_space<vmem>>, vector<1x128xf32>
    %c0_2 = arith.constant 0 : index
    %c0_3 = arith.constant 0 : index
    %4 = vector.load %arg5[%c0_2, %c0_3] : memref<128x128xf32, #tpu.memory_space<vmem>>, vector<128x128xf32>
    %cst = arith.constant dense<0.000000e+00> : vector<1x128xf32>
    %5 = tpu.matmul %3, %4, %cst {dimension_numbers = #tpu.dot_dimension_numbers<[1], [1], [0], [0], [0, 0, 1, 0], [], []>, precision = #tpu.contract_precision<fp32>} : vector<1x128xf32>, vector<128x128xf32>, vector<1x128xf32> -> vector<1x128xf32>
    %6 = arith.mulf %3, %3 : vector<1x128xf32>
    %cst_4 = arith.constant dense<0.000000e+00> : vector<1xf32>
    %7 = vector.multi_reduction <add>, %6, %cst_4 [1] : vector<1x128xf32> to vector<1xf32>
    %8 = vector.shape_cast %7 : vector<1xf32> to vector<1x1xf32>
    %c0_5 = arith.constant 0 : index
    %c0_6 = arith.constant 0 : index
    %9 = vector.load %arg4[%c0_5, %c0_6] : memref<1x128xf32, #tpu.memory_space<vmem>>, vector<1x128xf32>
    %10 = vector.broadcast %8 : vector<1x1xf32> to vector<1x128xf32>
    %11 = arith.addf %10, %9 : vector<1x128xf32>
    %cst_7 = arith.constant 2.000000e+00 : f32
    %12 = vector.broadcast %cst_7 : f32 to vector<1x128xf32>
    %13 = arith.mulf %12, %5 : vector<1x128xf32>
    %14 = arith.subf %11, %13 : vector<1x128xf32>
    %cst_8 = arith.constant -5.000000e-01 : f32
    %15 = vector.broadcast %cst_8 : f32 to vector<1x128xf32>
    %16 = arith.mulf %15, %14 : vector<1x128xf32>
    %17 = arith.index_cast %arg0 : i32 to index
    %18 = memref.load %arg1[%17] : memref<1xi32, #tpu.memory_space<smem>>
    %c128_i32 = arith.constant 128 : i32
    %19 = arith.muli %18, %c128_i32 : i32
    %20 = tpu.iota {dimensions = array<i32: 1>} : vector<1x128xi32>
    %21 = vector.broadcast %19 : i32 to vector<1x128xi32>
    %22 = arith.addi %20, %21 : vector<1x128xi32>
    %c0_9 = arith.constant 0 : index
    %23 = memref.load %arg2[%c0_9] : memref<5xi32, #tpu.memory_space<smem>>
    %c1 = arith.constant 1 : index
    %24 = memref.load %arg2[%c1] : memref<5xi32, #tpu.memory_space<smem>>
    %c2 = arith.constant 2 : index
    %25 = memref.load %arg2[%c2] : memref<5xi32, #tpu.memory_space<smem>>
    %c3 = arith.constant 3 : index
    %26 = memref.load %arg2[%c3] : memref<5xi32, #tpu.memory_space<smem>>
    %c4 = arith.constant 4 : index
    %27 = memref.load %arg2[%c4] : memref<5xi32, #tpu.memory_space<smem>>
    %28 = vector.broadcast %23 : i32 to vector<1x128xi32>
    %29 = arith.cmpi sge, %22, %28 : vector<1x128xi32>
    %30 = vector.broadcast %24 : i32 to vector<1x128xi32>
    %31 = arith.cmpi slt, %22, %30 : vector<1x128xi32>
    %32 = arith.andi %29, %31 : vector<1x128xi1>
    %33 = vector.broadcast %25 : i32 to vector<1x128xi32>
    %34 = arith.cmpi sge, %22, %33 : vector<1x128xi32>
    %35 = vector.broadcast %26 : i32 to vector<1x128xi32>
    %36 = arith.cmpi slt, %22, %35 : vector<1x128xi32>
    %37 = arith.andi %34, %36 : vector<1x128xi1>
    %38 = arith.ori %32, %37 : vector<1x128xi1>
    %39 = arith.cmpi slt, %arg0, %27 : i32
    %40 = vector.broadcast %39 : i1 to vector<1x128xi1>
    %41 = arith.andi %38, %40 : vector<1x128xi1>
    %cst_10 = arith.constant 0xFF800000 : f32
    %42 = vector.broadcast %cst_10 : f32 to vector<1x128xf32>
    %43 = arith.select %41, %16, %42 : vector<1x128xi1>, vector<1x128xf32>
    %c0_11 = arith.constant 0 : index
    %c0_12 = arith.constant 0 : index
    %44 = vector.load %arg6[%c0_11, %c0_12] : memref<1x128xf32, #tpu.memory_space<vmem>>, vector<1x128xf32>
    tpu.vector_store %arg6[%c0_11, %c0_12], %43 {strides = array<i32>} : memref<1x128xf32, #tpu.memory_space<vmem>>, vector<1x128xf32>,
    %c0_13 = arith.constant 0 : index
    %c0_14 = arith.constant 0 : index
    %45 = vector.load %arg8[%c0_13, %c0_14] : memref<1x1xf32, #tpu.memory_space<vmem>>, vector<1x1xf32>
    %cst_15 = arith.constant dense<0xFF800000> : vector<1xf32>
    %46 = vector.multi_reduction <maximumf>, %43, %cst_15 [1] : vector<1x128xf32> to vector<1xf32>
    %47 = vector.shape_cast %46 : vector<1xf32> to vector<1x1xf32>
    %48 = arith.maximumf %45, %47 : vector<1x1xf32>
    %cst_16 = arith.constant 0xFF800000 : f32
    %49 = vector.broadcast %cst_16 : f32 to vector<1x1xf32>
    %50 = arith.cmpf ogt, %48, %49 : vector<1x1xf32>
    %51 = arith.subf %45, %48 : vector<1x1xf32>
    %52 = math.exp %51 : vector<1x1xf32>
    %cst_17 = arith.constant 0.000000e+00 : f32
    %53 = vector.broadcast %cst_17 : f32 to vector<1x1xf32>
    %54 = arith.select %50, %52, %53 : vector<1x1xi1>, vector<1x1xf32>
    %55 = vector.broadcast %48 : vector<1x1xf32> to vector<1x128xf32>
    %56 = arith.subf %43, %55 : vector<1x128xf32>
    %57 = math.exp %56 : vector<1x128xf32>
    %cst_18 = arith.constant 0.000000e+00 : f32
    %58 = vector.broadcast %cst_18 : f32 to vector<1x128xf32>
    %59 = arith.select %41, %57, %58 : vector<1x128xi1>, vector<1x128xf32>
    %c0_19 = arith.constant 0 : index
    %c0_20 = arith.constant 0 : index
    %60 = vector.load %arg9[%c0_19, %c0_20] : memref<1x1xf32, #tpu.memory_space<vmem>>, vector<1x1xf32>
    %61 = arith.mulf %54, %60 : vector<1x1xf32>
    %cst_21 = arith.constant dense<0.000000e+00> : vector<1xf32>
    %62 = vector.multi_reduction <add>, %59, %cst_21 [1] : vector<1x128xf32> to vector<1xf32>
    %63 = vector.shape_cast %62 : vector<1xf32> to vector<1x1xf32>
    %64 = arith.addf %61, %63 : vector<1x1xf32>
    %c0_22 = arith.constant 0 : index
    %c0_23 = arith.constant 0 : index
    %65 = vector.load %arg9[%c0_22, %c0_23] : memref<1x1xf32, #tpu.memory_space<vmem>>, vector<1x1xf32>
    tpu.vector_store %arg9[%c0_22, %c0_23], %64 {strides = array<i32>} : memref<1x1xf32, #tpu.memory_space<vmem>>, vector<1x1xf32>,
    %c0_24 = arith.constant 0 : index
    %c0_25 = arith.constant 0 : index
    %66 = vector.load %arg8[%c0_24, %c0_25] : memref<1x1xf32, #tpu.memory_space<vmem>>, vector<1x1xf32>
    tpu.vector_store %arg8[%c0_24, %c0_25], %48 {strides = array<i32>} : memref<1x1xf32, #tpu.memory_space<vmem>>, vector<1x1xf32>,
    %c0_i32_26 = arith.constant 0 : i32
    %67 = arith.cmpi eq, %arg0, %c0_i32_26 : i32
    %68 = arith.extui %67 : i1 to i32
    %c0_i32_27 = arith.constant 0 : i32
    %69 = arith.cmpi ne, %68, %c0_i32_27 : i32
    scf.if %69 {
      %c0_28 = arith.constant 0 : index
      %c0_29 = arith.constant 0 : index
      %70 = vector.load %arg8[%c0_28, %c0_29] : memref<1x1xf32, #tpu.memory_space<vmem>>, vector<1x1xf32>
      %c0_30 = arith.constant 0 : index
      %c0_31 = arith.constant 0 : index
      %71 = vector.load %arg9[%c0_30, %c0_31] : memref<1x1xf32, #tpu.memory_space<vmem>>, vector<1x1xf32>
      %72 = math.log %71 : vector<1x1xf32>
      %73 = arith.addf %70, %72 : vector<1x1xf32>
      %c0_32 = arith.constant 0 : index
      %c0_33 = arith.constant 0 : index
      %74 = vector.load %arg7[%c0_32, %c0_33] : memref<1x1xf32, #tpu.memory_space<vmem>>, vector<1x1xf32>
      tpu.vector_store %arg7[%c0_32, %c0_33], %73 {strides = array<i32>} : memref<1x1xf32, #tpu.memory_space<vmem>>, vector<1x1xf32>,
    } else {
    }
    return
  }
  func.func @transform_0(%arg0: i32, %arg1: memref<1xi32, #tpu.memory_space<smem>>, %arg2: memref<5xi32, #tpu.memory_space<smem>>) -> (i32, i32) {
    %c0_i32 = arith.constant 0 : i32
    %c0_i32_0 = arith.constant 0 : i32
    %c0_i32_1 = arith.constant 0 : i32
    return %c0_i32, %c0_i32_0 : i32, i32
  }
  func.func @transform_1(%arg0: i32, %arg1: memref<1xi32, #tpu.memory_space<smem>>, %arg2: memref<5xi32, #tpu.memory_space<smem>>) -> (i32, i32) {
    %0 = arith.index_cast %arg0 : i32 to index
    %1 = memref.load %arg1[%0] : memref<1xi32, #tpu.memory_space<smem>>
    %c0_i32 = arith.constant 0 : i32
    %c0_i32_0 = arith.constant 0 : i32
    return %c0_i32, %1 : i32, i32
  }
  func.func @transform_2(%arg0: i32, %arg1: memref<1xi32, #tpu.memory_space<smem>>, %arg2: memref<5xi32, #tpu.memory_space<smem>>) -> (i32, i32) {
    %0 = arith.index_cast %arg0 : i32 to index
    %1 = memref.load %arg1[%0] : memref<1xi32, #tpu.memory_space<smem>>
    %c0_i32 = arith.constant 0 : i32
    %c0_i32_0 = arith.constant 0 : i32
    return %1, %c0_i32 : i32, i32
  }
  func.func @transform_3(%arg0: i32, %arg1: memref<1xi32, #tpu.memory_space<smem>>, %arg2: memref<5xi32, #tpu.memory_space<smem>>) -> (i32, i32) {
    %c0_i32 = arith.constant 0 : i32
    %c0_i32_0 = arith.constant 0 : i32
    return %c0_i32, %arg0 : i32, i32
  }
  func.func @transform_4(%arg0: i32, %arg1: memref<1xi32, #tpu.memory_space<smem>>, %arg2: memref<5xi32, #tpu.memory_space<smem>>) -> (i32, i32) {
    %c0_i32 = arith.constant 0 : i32
    %c0_i32_0 = arith.constant 0 : i32
    %c0_i32_1 = arith.constant 0 : i32
    return %c0_i32, %c0_i32_0 : i32, i32
  }
}

</mosaic_0001>

<bundles_post_ra>
// kernel: _distance_logits.1
= control target key start
LH: loop header
LB: loop body
LE: loop exit
PB: predicated region body
PF: predicated region fallthrough
CT: control target
= control target key end

     0   :  { %s663_s24 = smov [#allocation6]   ;;  %s1017_s0 = inlined_call_operand.<no memory space> [shape: s32[1], index: 0, kind: input, shape index: {}]   ;;  %s1018_s1 = inlined_call_operand.vmem [shape: s32[5], index: 1, kind: input, shape index: {}]   ;;  %s1019_s2 = inlined_call_operand.vmem [shape: f32[1,128], index: 2, kind: input, shape index: {}]   ;;  %s1020_s3 = inlined_call_operand.vmem [shape: f32[1,128], index: 3, kind: input, shape index: {}]   ;;  %s1021_s4 = inlined_call_operand.hbm [shape: f32[128,128], index: 4, kind: input, shape index: {}]   ;;  %s1022_s5 = inlined_call_operand.hbm [shape: f32[1,128], index: 5, kind: output, shape index: {0}]   ;;  %s1023_s6 = inlined_call_operand.hbm [shape: f32[1,1], index: 6, kind: output, shape index: {1}]  }
   0x1   :  { %s14_s23 = sshll.u32 %s1018_s1, 4  ;;  %s15_s23 = int_to_ptr.vmem [resolvable:$true] %s14_s23 }
   0x2   :  { %17 = dma.vmem_to_smem %s15_s23, 16, %s663_s24, [#allocation4] }
   0x3   :  { %655 = dma.done.wait [#allocation4], 16 }
   0x4   :  { %656 = vsyncadd [#allocation4], 4294967280 }
   0x5   :  { %20 = sfence }
   0x6   :  { %21 = vsyncpa [#allocation8], 0 }
   0x7   :  { %22 = vsyncpa [#allocation9], 0 }
   0x8   :  { %23 = vsyncpa [#allocation12], 0  ;;  %s553_s27 = sshll.u32 %s1017_s0, 7  ;;  %s664_s8 = smov [#allocation7]  }
   0x9   :  { %s40_s1 = scalar_lea.hbm %s1021_s4, %s553_s27  ;;  %s43_s9 = sshll.u32 %s664_s8, 4  ;;  %s44_s9 = int_to_ptr.vmem [resolvable:$true] %s43_s9 }
   0xa   :  { %s41_s10 = sshll.u32 %s40_s1, 4  ;;  %s587_s15 = scalar_lea.hbm %s1021_s4, 128  ;;  %s42_s10 = int_to_ptr.hbm [resolvable:$true] %s41_s10 }
   0xb   :  { %s583_s11 = sshra.s32 %s42_s10, 4  ;;  %s584_s11 = int_to_ptr.hbm [resolvable:$true] %s583_s11 }
   0xc   :  { %s585_s12 = scalar_lea.hbm %s584_s11, 128  ;;  %p588_p1 = scmp.lt.s32.totalorder %s584_s11, %s1021_s4 }
   0xd   :  { %p586_p0 = scmp.ne.s32.totalorder %s584_s11, %s585_s12  ;;  %p589_p2 = scmp.lt.s32.totalorder %s587_s15, %s585_s12 }
   0xf   :  { %p590_p3 = por %p589_p2, %p588_p1 }
  0x11   :  { %p591_p4 = pnand %p590_p3, %p586_p0 }
  0x13   :  { %594 = shalt.err (!%p591_p4)
}
  0x14   :  { %s665_s18 = smov 128   ;;  %s666_s19 = smov 8  }
  0x15   :  { %49 = dma.hbm_to_vmem [thread:$0]  %s42_s10, 2048, %s44_s9, [#allocation8], %s665_s18, %s665_s18, %s666_s19  }
  0x16   :  { %657 = dma.done.wait [#allocation8], 2048  }
  0x17   :  { %658 = vsyncadd [#allocation8], 4294965248  ;;  %v88_v0 = vld [vmem:[#allocation7 + $0x78] sm:$0xff]  ;;  %v87_v1 = vld [vmem:[#allocation7 + $0x70] sm:$0xff]  ;;  %vm431_vm0 = vcmask 1040384   ;;  %vm69_vm1 = vcmask 0  }
  0x18   :  { %v86_v2 = vld [vmem:[#allocation7 + $0x68] sm:$0xff]  ;;  %v726_v3 = vand.u32 4294901760, %v88_v0  ;;  %v728_v4 = vand.u32 4294901760, %v87_v1  ;;  %v85_v6 = vld [vmem:[#allocation7 + $0x60] sm:$0xff]  ;;  %v84_v11 = vld [vmem:[#allocation7 + $0x58] sm:$0xff]  ;;  %s446_s21 = sld [smem:[#allocation6]] }
  0x19   :  { %v730_v5 = vand.u32 4294901760, %v86_v2  ;;  %v739_v9 = vand.u32 4294901760, %v85_v6  ;;  %v748_v14 = vand.u32 4294901760, %v84_v11  ;;  %v83_v19 = vld [vmem:[#allocation7 + $0x50] sm:$0xff]  ;;  %v82_v26 = vld [vmem:[#allocation7 + $0x48] sm:$0xff]  ;;  %v81_v32 = vld [vmem:[#allocation7 + $0x40] sm:$0xff] }
  0x1a   :  { %90 = vmatpush.xpose.msra.mxu0 %v726_v3  ;;  %v734_v7 = vsub.f32 %v88_v0, %v726_v3  ;;  %v737_v8 = vsub.f32 %v87_v1, %v728_v4  ;;  %286 = vmatpush.xpose.msra.mxu3 %v726_v3  ;;  %v763_v21 = vand.u32 4294901760, %v83_v19  ;;  %v775_v27 = vand.u32 4294901760, %v82_v26  ;;  %v80_v38 = vld [vmem:[#allocation7 + $0x38] sm:$0xff]  ;;  %v79_v44 = vld [vmem:[#allocation7 + $0x30] sm:$0xff]  ;;  %v78_v50 = vld [vmem:[#allocation7 + $0x28] sm:$0xff]  ;;  %s548_s22 = sld [smem:[#allocation6 + $0x1]] }
  0x1b   :  { %v742_v10 = vsub.f32 %v86_v2, %v730_v5  ;;  %v759_v18 = vsub.f32 %v85_v6, %v739_v9  ;;  %v771_v25 = vsub.f32 %v84_v11, %v748_v14  ;;  %v795_v37 = vand.u32 4294901760, %v81_v32  ;;  %v77_v56 = vld [vmem:[#allocation7 + $0x20] sm:$0xff]  ;;  %v76_v62 = vld [vmem:[#allocation7 + $0x18] sm:$0xff]  ;;  %v75_v11 = vld [vmem:[#allocation7 + $0x10] sm:$0xff]  ;;  %s549_s23 = sld [smem:[#allocation6 + $0x2]]  ;;  %p59_p5 = scmp.lt.s32.totalorder %s1017_s0, 0 }
  0x1c   :  { %v132_v12 = vand.u32 4294901760, %v734_v7  ;;  %v138_v13 = vand.u32 4294901760, %v737_v8  ;;  %233 = vmatpush.xpose.msra.mxu2 %v734_v7  ;;  %v783_v31 = vsub.f32 %v83_v19, %v763_v21  ;;  %v788_v33 = vsub.f32 %v82_v26, %v775_v27  ;;  %s550_s24 = sld [smem:[#allocation6 + $0x3]]  ;;  %s514_s10 = sshll.u32 %s1022_s5, 4  ;;  %s515_s10 = int_to_ptr.hbm [resolvable:$true] %s514_s10 }
  0x1d   :  { %v144_v17 = vand.u32 4294901760, %v742_v10  ;;  %v150_v24 = vand.u32 4294901760, %v759_v18  ;;  %v156_v30 = vand.u32 4294901760, %v771_v25  ;;  %v804_v42 = vand.u32 4294901760, %v80_v38  ;;  %s1033_s0 = smov (!%p59_p5, %s1017_s0), 0  ;;  %s670_s11 = smov [#allocation10]  }
  0x1e   :  { %92 = vmatpush.xpose.msra.mxu0 %v728_v4  ;;  %v133_v15 = vsub.f32 %v734_v7, %v132_v12  ;;  %v139_v16 = vsub.f32 %v737_v8, %v138_v13  ;;  %288 = vmatpush.xpose.msra.mxu3 %v728_v4  ;;  %v162_v36 = vand.u32 4294901760, %v783_v31  ;;  %v168_v39 = vand.u32 4294901760, %v788_v33  ;;  %v72_v7 = vld [vmem:[%s1019_s2] sm:$0x1]  ;;  %s551_s2 = sld [smem:[#allocation6 + $0x4]]  ;;  %s61_s9 = scalar_lea.vmem %s1020_s3, %s1033_s0 }
  0x1f   :  { %v145_v23 = vsub.f32 %v742_v10, %v144_v17  ;;  %v151_v29 = vsub.f32 %v759_v18, %v150_v24  ;;  %v157_v35 = vsub.f32 %v771_v25, %v156_v30  ;;  %v807_v43 = vsub.f32 %v81_v32, %v795_v37  ;;  %s512_s12 = sshll.u32 %s670_s11, 4  ;;  %s671_s5 = smov [#allocation11]   ;;  %s513_s12 = int_to_ptr.vmem [resolvable:$true] %s512_s12 }
  0x20   :  { %v134_v20 = vand.u32 4294901760, %v133_v15  ;;  %236 = vmatpush.xpose.msra.mxu2 %v737_v8  ;;  %v140_v22 = vand.u32 4294901760, %v139_v16  ;;  %v163_v41 = vsub.f32 %v783_v31, %v162_v36  ;;  %v169_v45 = vsub.f32 %v788_v33, %v168_v39  ;;  %s523_s13 = sshll.u32 %s671_s5, 4  ;;  %s525_s16 = sshll.u32 %s1023_s6, 4  ;;  %s524_s13 = int_to_ptr.vmem [resolvable:$true] %s523_s13  ;;  %s526_s16 = int_to_ptr.hbm [resolvable:$true] %s525_s16 }
  0x21   :  { %v146_v28 = vand.u32 4294901760, %v145_v23  ;;  %v152_v34 = vand.u32 4294901760, %v151_v29  ;;  %v158_v40 = vand.u32 4294901760, %v157_v35  ;;  %v174_v47 = vand.u32 4294901760, %v807_v43  ;;  %v74_v23 = vld [vmem:[#allocation7 + $0x8] sm:$0xff]  ;;  %v73_v35 = vld [vmem:[#allocation7] sm:$0xff] }
  0x22   :  { %135 = vmatpush.xpose.msra.mxu1 %v134_v20  ;;  %94 = vmatpush.xpose.msra.mxu0 %v730_v5  ;;  %v164_v46 = vand.u32 4294901760, %v163_v41  ;;  %v816_v48 = vand.u32 4294901760, %v79_v44  ;;  %v819_v49 = vsub.f32 %v80_v38, %v804_v42  ;;  %v170_v51 = vand.u32 4294901760, %v169_v45 }
  0x23   :  { %290 = vmatpush.xpose.msra.mxu3 %v730_v5  ;;  %v175_v52 = vsub.f32 %v807_v43, %v174_v47  ;;  %v828_v54 = vand.u32 4294901760, %v78_v50  ;;  %v835_v57 = vand.u32 4294901760, %v77_v56  ;;  %v855_v6 = vand.u32 4294901760, %v76_v62 }
  0x24   :  { %239 = vmatpush.xpose.msra.mxu2 %v742_v10  ;;  %v180_v53 = vand.u32 4294901760, %v819_v49  ;;  %v831_v55 = vsub.f32 %v79_v44, %v816_v48  ;;  %v864_v20 = vand.u32 4294901760, %v75_v11  ;;  %v876_v32 = vand.u32 4294901760, %v74_v23  ;;  %p552_p6 = scmp.gt.s32.totalorder %s551_s2, 0 }
  0x25   :  { %v176_v58 = vand.u32 4294901760, %v175_v52  ;;  %v843_v61 = vsub.f32 %v78_v50, %v828_v54  ;;  %v848_v63 = vsub.f32 %v77_v56, %v835_v57  ;;  %v888_v44 = vand.u32 4294901760, %v73_v35 }
  0x26   :  { %141 = vmatpush.xpose.msra.mxu1 %v140_v22  ;;  %96 = vmatpush.xpose.msra.mxu0 %v739_v9  ;;  %v181_v59 = vsub.f32 %v819_v49, %v180_v53  ;;  %v186_v60 = vand.u32 4294901760, %v831_v55  ;;  %v867_v22 = vsub.f32 %v76_v62, %v855_v6  ;;  %v891_v45 = vsub.f32 %v74_v23, %v876_v32 }
  0x27   :  { %292 = vmatpush.xpose.msra.mxu3 %v739_v9  ;;  %v192_v2 = vand.u32 4294901760, %v843_v61  ;;  %v198_v15 = vand.u32 4294901760, %v848_v63  ;;  %v221_v52 = vsub.f32 %v73_v35, %v888_v44  ;;  %v121_v8 = vand.u32 4294901760, %v72_v7 }
  0x28   :  { %242 = vmatpush.xpose.msra.mxu2 %v759_v18  ;;  %v182_v0 = vand.u32 4294901760, %v181_v59  ;;  %v187_v1 = vsub.f32 %v831_v55, %v186_v60  ;;  %v204_v29 = vand.u32 4294901760, %v867_v22  ;;  %v669_v23 = vmov 0.0  }
  0x29   :  { %v193_v19 = vsub.f32 %v843_v61, %v192_v2  ;;  %v199_v26 = vsub.f32 %v848_v63, %v198_v15  ;;  %v222_v59 = vand.u32 4294901760, %v221_v52  ;;  %71 = vst.msk [vmem:[#allocation3] sm:$0x1] %vm69_vm1, %v669_v23 }
  0x2a   :  { %147 = vmatpush.xpose.msra.mxu1 %v146_v28  ;;  %98 = vmatpush.xpose.msra.mxu0 %v748_v14  ;;  %v188_v16 = vand.u32 4294901760, %v187_v1 }
  0x2b   :  { %294 = vmatpush.xpose.msra.mxu3 %v748_v14  ;;  %v194_v28 = vand.u32 4294901760, %v193_v19  ;;  %v200_v38 = vand.u32 4294901760, %v199_v26 }
  0x2c   :  { %245 = vmatpush.xpose.msra.mxu2 %v771_v25 }
  0x2e   :  { %153 = vmatpush.xpose.msra.mxu1 %v152_v34  ;;  %100 = vmatpush.xpose.msra.mxu0 %v763_v21  ;;  %v879_v34 = vsub.f32 %v75_v11, %v864_v20 }
  0x2f   :  { %296 = vmatpush.xpose.msra.mxu3 %v763_v21 }
  0x30   :  { %248 = vmatpush.xpose.msra.mxu2 %v783_v31  ;;  %v210_v41 = vand.u32 4294901760, %v879_v34 }
  0x32   :  { %159 = vmatpush.xpose.msra.mxu1 %v158_v40  ;;  %102 = vmatpush.xpose.msra.mxu0 %v775_v27  ;;  %v205_v40 = vsub.f32 %v867_v22, %v204_v29  ;;  %v211_v50 = vsub.f32 %v879_v34, %v210_v41 }
  0x33   :  { %298 = vmatpush.xpose.msra.mxu3 %v775_v27 }
  0x34   :  { %251 = vmatpush.xpose.msra.mxu2 %v788_v33  ;;  %v212_v56 = vand.u32 4294901760, %v211_v50 }
  0x36   :  { %165 = vmatpush.xpose.msra.mxu1 %v164_v46  ;;  %104 = vmatpush.xpose.msra.mxu0 %v795_v37  ;;  %v206_v46 = vand.u32 4294901760, %v205_v40 }
  0x37   :  { %300 = vmatpush.xpose.msra.mxu3 %v795_v37 }
  0x38   :  { %254 = vmatpush.xpose.msra.mxu2 %v807_v43 }
  0x3a   :  { %171 = vmatpush.xpose.msra.mxu1 %v170_v51  ;;  %106 = vmatpush.xpose.msra.mxu0 %v804_v42  ;;  %v216_v51 = vand.u32 4294901760, %v891_v45 }
  0x3b   :  { %302 = vmatpush.xpose.msra.mxu3 %v804_v42 }
  0x3c   :  { %257 = vmatpush.xpose.msra.mxu2 %v819_v49 }
  0x3e   :  { %177 = vmatpush.xpose.msra.mxu1 %v176_v58  ;;  %108 = vmatpush.xpose.msra.mxu0 %v816_v48  ;;  %v217_v58 = vsub.f32 %v891_v45, %v216_v51 }
  0x3f   :  { %304 = vmatpush.xpose.msra.mxu3 %v816_v48 }
  0x40   :  { %260 = vmatpush.xpose.msra.mxu2 %v831_v55  ;;  %v218_v62 = vand.u32 4294901760, %v217_v58 }
  0x42   :  { %183 = vmatpush.xpose.msra.mxu1 %v182_v0  ;;  %110 = vmatpush.xpose.msra.mxu0 %v828_v54  ;;  %v223_v0 = vsub.f32 %v221_v52, %v222_v59 }
  0x43   :  { %306 = vmatpush.xpose.msra.mxu3 %v828_v54 }
  0x44   :  { %263 = vmatpush.xpose.msra.mxu2 %v843_v61  ;;  %v224_v1 = vand.u32 4294901760, %v223_v0 }
  0x46   :  { %189 = vmatpush.xpose.msra.mxu1 %v188_v16  ;;  %112 = vmatpush.xpose.msra.mxu0 %v835_v57 }
  0x47   :  { %308 = vmatpush.xpose.msra.mxu3 %v835_v57 }
  0x48   :  { %266 = vmatpush.xpose.msra.mxu2 %v848_v63 }
  0x4a   :  { %195 = vmatpush.xpose.msra.mxu1 %v194_v28  ;;  %114 = vmatpush.xpose.msra.mxu0 %v855_v6 }
  0x4b   :  { %310 = vmatpush.xpose.msra.mxu3 %v855_v6 }
  0x4c   :  { %269 = vmatpush.xpose.msra.mxu2 %v867_v22  ;;  %v668_v22 = vmov 0  }
  0x4d   :  { %563 = vset.pattern.permute.xlu1 %v668_v22  ;;  %564 = vset.pattern.permute.xlu0 %v668_v22 }
  0x4e   :  { %201 = vmatpush.xpose.msra.mxu1 %v200_v38  ;;  %116 = vmatpush.xpose.msra.mxu0 %v864_v20 }
  0x4f   :  { %312 = vmatpush.xpose.msra.mxu3 %v864_v20 }
  0x50   :  { %272 = vmatpush.xpose.msra.mxu2 %v879_v34 }
  0x52   :  { %207 = vmatpush.xpose.msra.mxu1 %v206_v46  ;;  %118 = vmatpush.xpose.msra.mxu0 %v876_v32 }
  0x53   :  { %314 = vmatpush.xpose.msra.mxu3 %v876_v32 }
  0x54   :  { %275 = vmatpush.xpose.msra.mxu2 %v891_v45 }
  0x56   :  { %213 = vmatpush.xpose.msra.mxu1 %v212_v56  ;;  %120 = vmatpush.xpose.msra.mxu0 %v888_v44 }
  0x57   :  { %316 = vmatpush.xpose.msra.mxu3 %v888_v44 }
  0x58   :  { %278 = vmatpush.xpose.msra.mxu2 %v221_v52  ;;  %v489_v52 = vld [vmem:[#allocation3] sm:$0x1] }
  0x5a   :  { %327 = vmatpush.xpose.msrb.mxu0 %v132_v12  ;;  %219 = vmatpush.xpose.msra.mxu1 %v218_v62  ;;  %v122_v12 = vsub.f32 %v72_v7, %v121_v8 }
  0x5c   :  { %281 = vmatmul.f32.vlgmr.msra.gmra.mxu2 %v122_v12 }
  0x5e   :  { %331 = vmatpush.xpose.msrb.mxu0 %v138_v13  ;;  %225 = vmatpush.xpose.msra.mxu1 %v224_v1  ;;  %v667_v13 = vmov -inf  }
  0x5f   :  { %70 = vst.msk [vmem:[#allocation2] sm:$0x1] %vm69_vm1, %v667_v13 }
  0x61   :  { %227 = vmatmul.f32.vlgmr.msra.gmra.mxu1 %v121_v8 }
  0x62   :  { %394 = vmatpush.xpose.msrb.mxu1 %v726_v3  ;;  %335 = vmatpush.xpose.msrb.mxu0 %v144_v17  ;;  %v123_v3 = vand.u32 4294901760, %v122_v12  ;;  %v442_v17 = vlaneseq }
  0x64   :  { %320 = vmatmul.f32.vlgmr.msra.gmra.mxu3 %v123_v3  ;;  %v443_v25 = vand.u32 127, %v442_v17 }
  0x66   :  { %396 = vmatpush.xpose.msrb.mxu1 %v728_v4  ;;  %339 = vmatpush.xpose.msrb.mxu0 %v150_v24  ;;  %v124_v4 = vsub.f32 %v122_v12, %v123_v3  ;;  %v469_v26 = vld [vmem:[#allocation2] sm:$0x1] }
  0x6a   :  { %398 = vmatpush.xpose.msrb.mxu1 %v730_v5  ;;  %343 = vmatpush.xpose.msrb.mxu0 %v156_v30  ;;  %v125_v5 = vand.u32 4294901760, %v124_v4 }
  0x6c   :  { %126 = vmatmul.f32.vlgmr.msra.gmra.mxu0 %v125_v5 }
  0x6e   :  { %400 = vmatpush.xpose.msrb.mxu1 %v739_v9  ;;  %347 = vmatpush.xpose.msrb.mxu0 %v162_v36  ;;  %v430_v9 = vmul.f32 %v72_v7, %v72_v7  ;;  %v451_v36 = vstv %s446_s21 }
  0x70   :  { %v432_v10 = vsel %vm431_vm0, %v430_v9, 0.0 }
  0x71   :  { %433 = vadd.xlane.f32.xlu0 %v432_v10 }
  0x72   :  { %402 = vmatpush.xpose.msrb.mxu1 %v748_v14  ;;  %351 = vmatpush.xpose.msrb.mxu0 %v168_v39  ;;  %v456_v39 = vstv %s549_s23 }
  0x76   :  { %404 = vmatpush.xpose.msrb.mxu1 %v763_v21  ;;  %355 = vmatpush.xpose.msrb.mxu0 %v174_v47 }
  0x7a   :  { %406 = vmatpush.xpose.msrb.mxu1 %v775_v27  ;;  %359 = vmatpush.xpose.msrb.mxu0 %v180_v53  ;;  %v444_v27 = vstv %s553_s27  ;;  %s463_s27 = scalar_select %p552_p6, 1, 0  ;;  %v435_v53 = vld [vmem:[%s61_s9] sm:$0x1] }
  0x7b   :  { %v445_v33 = vadd.s32 %v444_v27, %v443_v25 }
  0x7d   :  { %vm971_vm2 = vcmp.ge.s32.totalorder %v445_v33, %v451_v36  ;;  %vm457_vm4 = vcmp.ge.s32.totalorder %v445_v33, %v456_v39 }
  0x7e   :  { %408 = vmatpush.xpose.msrb.mxu1 %v795_v37  ;;  %363 = vmatpush.xpose.msrb.mxu0 %v186_v60  ;;  %v453_v37 = vstv %s548_s22  ;;  %v464_v60 = vstv %s463_s27 }
  0x7f   :  { %vm975_vm3 = vcmp.lt.s32.totalorder %v445_v33, %v453_v37  ;;  %vm987_vm9 = vcmp.eq.s32.totalorder %v464_v60, 1 }
  0x80   :  { %vm455_vm6 = vmand %vm971_vm2, %vm975_vm3 }
  0x82   :  { %410 = vmatpush.xpose.msrb.mxu1 %v804_v42  ;;  %367 = vmatpush.xpose.msrb.mxu0 %v192_v2  ;;  %v458_v42 = vstv %s550_s24 }
  0x83   :  { %vm459_vm5 = vcmp.lt.s32.totalorder %v445_v33, %v458_v42 }
  0x84   :  { %vm460_vm7 = vmand %vm457_vm4, %vm459_vm5 }
  0x85   :  { %vm983_vm8 = vmor %vm455_vm6, %vm460_vm7 }
  0x86   :  { %412 = vmatpush.xpose.msrb.mxu1 %v816_v48  ;;  %371 = vmatpush.xpose.msrb.mxu0 %v198_v15  ;;  %vm466_vm10 = vmand %vm983_vm8, %vm987_vm9 }
  0x8a   :  { %414 = vmatpush.xpose.msrb.mxu1 %v828_v54  ;;  %375 = vmatpush.xpose.msrb.mxu0 %v204_v29 }
  0x8e   :  { %416 = vmatpush.xpose.msrb.mxu1 %v835_v57  ;;  %379 = vmatpush.xpose.msrb.mxu0 %v210_v41 }
  0x92   :  { %418 = vmatpush.xpose.msrb.mxu1 %v855_v6  ;;  %383 = vmatpush.xpose.msrb.mxu0 %v216_v51 }
  0x96   :  { %420 = vmatpush.xpose.msrb.mxu1 %v864_v20  ;;  %387 = vmatpush.xpose.msrb.mxu0 %v222_v59 }
  0x99   :  { %389 = vmatmul.f32.vlgmr.msrb.gmra.mxu0 %v121_v8 }
  0x9a   :  { %422 = vmatpush.xpose.msrb.mxu1 %v876_v32 }
  0x9e   :  { %424 = vmatpush.xpose.msrb.mxu1 %v888_v44 }
  0xa1   :  { %426 = vmatmul.f32.vlgmr.msrb.gmra.mxu1 %v121_v8 }
  0xde   :  { %v228_v14 = vpop.f32.mrf.mxu1 }
  0xdf   :  { %v282_v24 = vpop.f32.mrf.mxu2 }
  0xe4   :  { %v434_v54 = vpop.xlane.xlu0 %433 }
  0xe5   :  { %v436_v63 = vadd.f32 %v435_v53, %v434_v54 }
  0xe7   :  { %v321_v31 = vpop.f32.mrf.mxu3 }
  0xe9   :  { %v127_v18 = vpop.f32.mrf.mxu0 }
  0xea   :  { %v229_v21 = vadd.f32 %v228_v14, %v127_v18 }
  0xec   :  { %v283_v30 = vadd.f32 %v282_v24, %v229_v21 }
  0xee   :  { %v322_v43 = vadd.f32 %v321_v31, %v283_v30 }
 0x116   :  { %v390_v47 = vpop.f32.mrf.mxu0 }
 0x117   :  { %v391_v55 = vadd.f32 %v390_v47, %v322_v43 }
 0x11e   :  { %v427_v57 = vpop.f32.mrf.mxu1 }
 0x11f   :  { %v428_v61 = vadd.f32 %v427_v57, %v391_v55 }
 0x121   :  { %v437_v2 = vmul.f32 2.0, %v428_v61 }
 0x123   :  { %v438_v15 = vsub.f32 %v436_v63, %v437_v2 }
 0x125   :  { %v439_v16 = vmul.f32 -0.5, %v438_v15 }
 0x127   :  { %v467_v19 = vsel %vm466_vm10, %v439_v16, -inf }
 0x128   :  { %v470_v20 = vsel %vm431_vm0, %v467_v19, -inf  ;;  %468 = vst [vmem:[#allocation10] sm:$0x1] %v467_v19 }
 0x129   :  { %471 = vmax.xlane.f32.xlu0 %v470_v20  ;;  %517 = dma.vmem_to_hbm [thread:$0]  %s513_s12, 16, %s515_s10, [#allocation9]  }
 0x19c   :  { %v472_v28 = vpop.xlane.xlu0 %471 }
 0x19d   :  { %v473_v29 = vmax.f32 %v469_v26, %v472_v28 }
 0x19f   :  { %v475_v32 = vsub.f32 %v469_v26, %v473_v29  ;;  %497 = vst.msk [vmem:[#allocation2] sm:$0x1] %vm69_vm1, %v473_v29  ;;  %481 = vperm.xlu1 %563, %v473_v29   ;;  %vm474_vm11 = vcmp.gt.f32.partialorder %v473_v29, -inf }
 0x1a1   :  { %v476_v34 = vmul.f32 1.442695, %v475_v32 }
 0x1a3   :  { %565 = vpow2.f32 %v476_v34 }
 0x1a6   :  { %v501_v7 = vld [vmem:[#allocation2] sm:$0x1] }
 0x1a9   :  { %v566_v35 = vpop.eup %565 }
 0x1aa   :  { %v478_v38 = vsel %vm474_vm11, %v566_v35, 0.0 }
 0x1ab   :  { %v490_v56 = vmul.f32 %v489_v52, %v478_v38 }
 0x211   :  { %v482_v40 = vpop.permute.xlu1 %481 }
 0x212   :  { %v484_v41 = vperm.slane %v482_v40, 0 }
 0x214   :  { %v485_v44 = vsub.f32 %v467_v19, %v484_v41 }
 0x216   :  { %v486_v45 = vmul.f32 1.442695, %v485_v44 }
 0x218   :  { %567 = vpow2.f32 %v486_v45 }
 0x21e   :  { %v568_v46 = vpop.eup %567 }
 0x21f   :  { %v488_v50 = vsel %vm466_vm10, %v568_v46, 0.0 }
 0x220   :  { %v491_v51 = vsel %vm431_vm0, %v488_v50, 0.0 }
 0x221   :  { %492 = vadd.xlane.f32.xlu1 %v491_v51 }
 0x294   :  { %v493_v58 = vpop.xlane.xlu1 %492 }
 0x295   :  { %v494_v59 = vadd.f32 %v493_v58, %v490_v56 }
 0x297   :  { %496 = vst.msk [vmem:[#allocation3] sm:$0x1] %vm69_vm1, %v494_v59 }
 0x29e   :  { %v502_v62 = vld [vmem:[#allocation3] sm:$0x1] }
 0x29f   :  { %569 = vlog2.f32 %v502_v62 }
 0x2a5   :  { %v570_v0 = vpop.eup %569 }
 0x2a6   :  { %v504_v1 = vmul.f32 0.6931472, %v570_v0 }
 0x2a8   :  { %v505_v8 = vadd.f32 %v504_v1, %v501_v7 }
 0x2aa   :  { %506 = vst.msk [vmem:[#allocation11] sm:$0x1] %vm69_vm1, %v505_v8 }
 0x2ab   :  { %528 = dma.vmem_to_hbm [thread:$0]  %s524_s13, 16, %s526_s16, [#allocation12]  }
 0x2ac   :  { %659 = dma.done.wait [#allocation9], 16  }
 0x2ad   :  { %660 = vsyncadd [#allocation9], 4294967280 }
 0x2ae   :  { %661 = dma.done.wait [#allocation12], 16  }
 0x2af   :  { %662 = vsyncadd [#allocation12], 4294967280 }
 0x2b0   :  { %537 = vsyncpa [#allocation8], 1 }
 0x2b1   :  { %538 = vsyncpa [#allocation9], 1 }
 0x2b2   :  { %539 = vsyncpa [#allocation12], 1 }

</bundles_post_ra>
